<compile_context>
chip_gen: v7x
topology: tpu7x:2x2x1
jax: 0.10.0
libtpu: 0.0.40
codegen_flags: <defaults>
</compile_context>

<pallas_src>
import functools
import math

import jax
import jax.numpy as jnp
from jax.experimental import pallas as pl
from jax.experimental.pallas import tpu as pltpu


# ----------------------------------------------------------------------------
# Pallas kernel: one generated layer = both hyper-MLPs (net_w & net_b), fused.
# ----------------------------------------------------------------------------
def _hyper_layer_kernel(cmd_ref, hpre_ref, w1c_ref, *rest, num_tail_layers, scale):
    """One grid step = `tile_b` batch rows of one generated layer (both heads).

    cmd_ref  : (tile_b*T, C)   command rows, replicated T times (pipelined)
    hpre_ref : (tile_b*T, 2H)  emb @ W1_emb + b1, batch-independent (resident)
    w1c_ref  : (C, 2H)         command half of the fused first layer (resident)
    rest     : (W_l, b_l) * num_tail_layers block-diag fused tails, then out_ref
    out_ref  : (tile_b*T, OUT_PAD) lane-dense slab; cols [0:64) w, [64:72) b
    """
    tail_refs = rest[:2 * num_tail_layers]
    out_ref = rest[-1]

    # Fused first layer: one big-M matmul per grid step (M = tile_b * T).
    h = jnp.dot(cmd_ref[...], w1c_ref[...], preferred_element_type=jnp.float32)
    h = jnp.maximum(h + hpre_ref[...], 0.0)

    for l in range(num_tail_layers):
        w = tail_refs[2 * l][...]
        b = tail_refs[2 * l + 1][...]
        h = jnp.dot(h, w, preferred_element_type=jnp.float32) + b
        if l < num_tail_layers - 1:
            h = jnp.maximum(h, 0.0)                  # ReLU on hidden layers only

    if scale != 1.0:
        h = h * scale                                # scale_layer_out epilogue
    out_ref[...] = h.astype(out_ref.dtype)           # one dense (rows, 128) store


def _choose_tile_b(batch, tiles, target_rows=2048):
    """Pick tile_b so that (tile_b * tiles) is a multiple of 8 (dense stores),
    the output block is ~1 MiB (tile_b*tiles ~ target_rows lanes of 128 f32),
    and the batch grid keeps >= 2 steps when the batch allows it (v7x: 2 TCs)."""
    g = 8 // math.gcd(tiles, 8)                       # tile_b multiple of g => rows % 8 == 0
    ideal = max(1, target_rows // max(tiles, 1))
    half = max(1, (batch + 1) // 2)
    tile_b = max(1, min(ideal, half))
    tile_b = max(g, ((tile_b + g - 1) // g) * g)      # round up to multiple of g
    return tile_b


def hyper_layer_pallas(emb2d, command, fused, *, scale=1.0, target_block_rows=2048,
                       interpret=False):
    """Run one generated layer (both heads) for the whole batch.

    emb2d   : (T, E)   flattened tile embeddings
    command : (B, C)   (command | conditioning)
    fused   : dict from _fuse_hypernetwork_params
    returns : (B, T, OUT_PAD) slab; cols [0:64) = w head, [64:72) = b head.
    """
    B, C = command.shape
    T, E = emb2d.shape
    w1e, w1c, b1 = fused["w1_emb"], fused["w1_cmd"], fused["b1"]
    tail = fused["tail"]
    outp = fused["out_padded"]
    assert w1c.shape[0] == C, (w1c.shape, C)

    tile_b = _choose_tile_b(B, T, target_block_rows)
    b_pad = (-B) % tile_b
    bp = B + b_pad
    grid = (bp // tile_b,)
    rows = tile_b * T                                 # multiple of 8 by construction

    # Batch-independent half of the first layer, hoisted out of the grid loop.
    hpre = emb2d @ w1e + b1                           # (T, 2H)
    hpre_rep = jnp.tile(hpre, (tile_b, 1))            # (tile_b*T, 2H)  VMEM-resident

    cmd_p = jnp.pad(command, ((0, b_pad), (0, 0))) if b_pad else command
    cmd_rep = jnp.repeat(cmd_p, T, axis=0)            # (Bp*T, C): only the C command lanes
                                                      # are replicated, never the embeddings

    flat_tail = [p for wb in tail for p in wb]
    kernel = functools.partial(_hyper_layer_kernel,
                               num_tail_layers=len(tail), scale=float(scale))

    in_specs = [
        pl.BlockSpec((rows, C), lambda i: (i, 0)),        # pipelined command block
        pl.BlockSpec(hpre_rep.shape, lambda i: (0, 0)),   # resident
        pl.BlockSpec(w1c.shape, lambda i: (0, 0)),        # resident
    ]
    for w, b in tail:
        in_specs.append(pl.BlockSpec(w.shape, lambda i: (0, 0)))
        in_specs.append(pl.BlockSpec(b.shape, lambda i: (0, 0)))
    out_spec = pl.BlockSpec((rows, outp), lambda i: (i, 0))

    # Chip-agnostic VMEM budget: 2x double-buffered blocks + resident weights,
    # capped at 48 MiB (safe on v7x's 64 MiB as well as v5e/v6e's 128 MiB).
    vmem_est = 2 * 4 * rows * (outp + C) + 4 * (
        hpre_rep.size + w1c.size + sum(w.size + b.size for w, b in tail))
    vmem_limit = int(min(48 << 20, max(32 << 20, 2 * vmem_est)))

    out = pl.pallas_call(
        kernel,
        grid=grid,
        in_specs=in_specs,
        out_specs=out_spec,
        out_shape=jax.ShapeDtypeStruct((bp * T, outp), jnp.float32),
        compiler_params=pltpu.CompilerParams(
            dimension_semantics=("parallel",),            # shards batch across TCs on v7x
            vmem_limit_bytes=vmem_limit),
        interpret=interpret,
    )(cmd_rep, hpre_rep, w1c, *flat_tail)
    return out.reshape(bp, T, outp)[:B]


# ----------------------------------------------------------------------------
# Host-side fusion of the net_w / net_b MLP parameters (done once at init).
# ----------------------------------------------------------------------------
def _block_diag(a, b):
    za = jnp.zeros((a.shape[0], b.shape[1]), a.dtype)
    zb = jnp.zeros((b.shape[0], a.shape[1]), a.dtype)
    top = jnp.concatenate([a, za], axis=1)
    bot = jnp.concatenate([zb, b], axis=1)
    return jnp.concatenate([top, bot], axis=0)


def _fuse_hypernetwork_params(hn, embedding_dim, lane_pad=128):
    net_w, net_b = hn["net_w"], hn["net_b"]
    num_linear = len(net_w)
    assert len(net_b) == num_linear and num_linear >= 2
    E = embedding_dim

    w1w, b1w = net_w[0]
    w1b, b1b = net_b[0]
    assert w1w.shape[0] == w1b.shape[0], "net_w / net_b must share z_dim here"
    cmd_dim = w1w.shape[0] - E
    w1f = jnp.concatenate([w1w, w1b], axis=1)                  # (E+C, 2H)
    fused = {
        "w1_emb": w1f[:E],                                     # (E, 2H)
        "w1_cmd": w1f[E:],                                     # (C, 2H)
        "b1": jnp.concatenate([b1w, b1b], axis=1),             # (1, 2H)
        "tail": [],
        "cmd_dim": cmd_dim,
    }
    for l in range(1, num_linear):
        ww, bw = net_w[l]
        wb, bb = net_b[l]
        wf = _block_diag(ww, wb)
        bf = jnp.concatenate([bw, bb], axis=1)
        if l == num_linear - 1:
            ncols = wf.shape[1]                                # 64 + 8 = 72
            pad = (-ncols) % lane_pad                          # -> 128-wide slab
            if pad:
                wf = jnp.pad(wf, ((0, 0), (0, pad)))           # padded cols are exactly 0
                bf = jnp.pad(bf, ((0, 0), (0, pad)))
            fused["out_cols_w"] = ww.shape[1]
            fused["out_cols_b"] = wb.shape[1]
            fused["out_padded"] = ncols + pad
        fused["tail"].append((wf, bf))
    return fused


# ----------------------------------------------------------------------------
# Deterministic parameter initialization (mirrors the PyTorch module shapes).
# ----------------------------------------------------------------------------
def init_linear(key, fan_in, fan_out):
    kw, kb = jax.random.split(key)
    bound = 1.0 / (fan_in ** 0.5)
    w = jax.random.uniform(kw, (fan_in, fan_out), jnp.float32, -bound, bound)
    b = jax.random.uniform(kb, (1, fan_out), jnp.float32, -bound, bound)
    return w, b


def init_mlp(key, sizes):
    keys = jax.random.split(key, len(sizes) - 1)
    return [init_linear(k, sizes[j], sizes[j + 1]) for j, k in enumerate(keys)]


def init_hypernetwork(key, hidden_sizes, z_dim_w, z_dim_b,
                      out_size_w=(8, 8), out_size_b=8):
    kw, kb = jax.random.split(key)
    total_el_w = out_size_w[0] * out_size_w[1]
    return {
        "net_w": init_mlp(kw, [z_dim_w] + list(hidden_sizes) + [total_el_w]),
        "net_b": init_mlp(kb, [z_dim_b] + list(hidden_sizes) + [out_size_b]),
        "out_size_w": tuple(out_size_w),
        "out_size_b": out_size_b,
    }


def _mlp_ref(x, params):
    h = x
    for l, (w, b) in enumerate(params):
        h = h @ w + b
        if l < len(params) - 1:
            h = jnp.maximum(h, 0.0)
    return h


# ----------------------------------------------------------------------------
# HyperNetworkGenerator forward
# ----------------------------------------------------------------------------
class HyperNetworkGeneratorPallas:
    def __init__(self, input_hn, hidden_hn, output_hn,
                 in_tiling, hidden_tiling, out_tiling,
                 in_embeddings, hidden_embeddings, out_embeddings,
                 layer_sizes, scale_layer_out=False, scale_parameter=1.0,
                 target_block_rows=2048):
        self.input_hn = input_hn
        self.hidden_hn = hidden_hn
        self.output_hn = output_hn
        self.in_tiling = in_tiling
        self.hidden_tiling = hidden_tiling
        self.out_tiling = out_tiling
        self.in_embeddings = in_embeddings            # (t0, t1, E)
        self.hidden_embeddings = hidden_embeddings    # list of (t0, t1, E)
        self.out_embeddings = out_embeddings          # (t0, t1, E)
        self.layer_sizes = layer_sizes
        self.scale_layer_out = scale_layer_out
        self.scale_parameter = scale_parameter
        self.target_block_rows = target_block_rows
        self.num_layers = 1
        if self.hidden_tiling is not None:
            self.num_layers += len(self.hidden_tiling)
        if self.out_tiling is not None:
            self.num_layers += 1
        emb_dim = in_embeddings.shape[-1]
        # Fuse (once) the net_w / net_b parameters of each distinct HyperNetwork.
        self.fused_in = _fuse_hypernetwork_params(input_hn, emb_dim)
        self.fused_hidden = (_fuse_hypernetwork_params(hidden_hn, emb_dim)
                             if hidden_hn is not None else None)
        self.fused_out = (_fuse_hypernetwork_params(output_hn, emb_dim)
                          if output_hn is not None else None)
        # TODO(synk): the three layer-generations could be stacked into a single
        # pallas_call (pad to a common T, concat tails along N -> wider MXU pass),
        # and the w-permute / b-mean epilogue could be folded into the kernel to
        # halve the dominant HBM traffic; kept as one fused call per layer here.

    def _select(self, i):
        if i == 0:
            return self.input_hn, self.fused_in, self.in_tiling, self.in_embeddings
        elif i == self.num_layers - 1:
            return self.output_hn, self.fused_out, self.out_tiling, self.out_embeddings
        else:
            return (self.hidden_hn, self.fused_hidden, self.hidden_tiling[i - 1],
                    self.hidden_embeddings[i - 1])

    def forward(self, command, conditioning=None):
        batch_size = command.shape[0]
        if conditioning is not None:
            command = jnp.concatenate([command, conditioning], axis=1)
        cmd_dim = command.shape[1]

        generated = []
        for i in range(self.num_layers):
            hn, fused, tiling, embeddings = self._select(i)
            t0, t1 = tiling
            tiles = t0 * t1
            emb_dim = embeddings.shape[-1]
            assert fused["cmd_dim"] == cmd_dim

            scale = 1.0
            if self.scale_layer_out:
                scale = float(self.scale_parameter) / math.sqrt(float(self.layer_sizes[i]))

            emb2d = embeddings.reshape(tiles, emb_dim)
            slab = hyper_layer_pallas(emb2d, command, fused, scale=scale,
                                      target_block_rows=self.target_block_rows)  # (B, T, 128)

            ow0, ow1 = hn["out_size_w"]
            ob = hn["out_size_b"]
            assert ob == ow0, "out_size_b must equal out_size_w[0] for the bias reshape"
            w = slab[:, :, :ow0 * ow1]
            b = slab[:, :, ow0 * ow1:ow0 * ow1 + ob]

            w = w.reshape(batch_size, t0, t1, ow0, ow1)
            w = jnp.transpose(w, (0, 2, 3, 1, 4))
            w = w.reshape(batch_size, t1 * ow0, t0 * ow1)
            b = b.reshape(batch_size, t0, t1, ow0).mean(axis=1)
            b = b.reshape(batch_size, t1 * ow0)
            generated.extend([w.reshape(batch_size, -1), b])
        return jnp.concatenate(generated, axis=1)

    # Pure-JAX reference mirroring the original PyTorch forward (for checking).
    def forward_reference(self, command, conditioning=None):
        batch_size = command.shape[0]
        if conditioning is not None:
            command = jnp.concatenate([command, conditioning], axis=1)
        cmd_dim = command.shape[1]
        generated = []
        for i in range(self.num_layers):
            hn, _, tiling, embeddings = self._select(i)
            t0, t1 = tiling
            emb_dim = embeddings.shape[-1]
            emb = jnp.broadcast_to(embeddings[None], (batch_size, t0, t1, emb_dim))
            emb = emb.reshape(-1, emb_dim)
            rcmd = jnp.broadcast_to(command[:, None, None, :],
                                    (batch_size, t0, t1, cmd_dim)).reshape(-1, cmd_dim)
            z = jnp.concatenate([emb, rcmd], axis=1)
            w = _mlp_ref(z, hn["net_w"])
            b = _mlp_ref(z, hn["net_b"])
            if self.scale_layer_out:
                s = self.scale_parameter / jnp.sqrt(
                    jnp.asarray(self.layer_sizes[i], jnp.float32))
                w = w * s
                b = b * s
            ow0, ow1 = hn["out_size_w"]
            w = w.reshape(batch_size, t0, t1, ow0, ow1)
            w = jnp.transpose(w, (0, 2, 3, 1, 4)).reshape(batch_size, t1 * ow0, t0 * ow1)
            b = b.reshape(batch_size, t0, t1, ow0).mean(axis=1).reshape(batch_size, t1 * ow0)
            generated.extend([w.reshape(batch_size, -1), b])
        return jnp.concatenate(generated, axis=1)


# ----------------------------------------------------------------------------
# Build a small deterministic instance and run it.
# ----------------------------------------------------------------------------
if __name__ == "__main__":
    key = jax.random.PRNGKey(0)
    (k_in, k_hid, k_out, k_emb_in, k_emb_hid, k_emb_out,
     k_cmd, k_cond) = jax.random.split(key, 8)

    batch_size = 4
    embedding_dim = 32
    command_dim = 1
    conditioning_dim = 3
    hidden_sizes = (32,)
    out_size_w = (8, 8)
    out_size_b = 8                      # must equal out_size_w[0] (as in PyTorch code)
    z_dim = embedding_dim + command_dim + conditioning_dim   # cat(embedding, command)

    in_tiling = [1, 2]
    hidden_tiling = [[2, 2]]
    out_tiling = [2, 1]
    layer_sizes = [4, 16, 2]

    input_hn = init_hypernetwork(k_in, hidden_sizes, z_dim, z_dim, out_size_w, out_size_b)
    hidden_hn = init_hypernetwork(k_hid, hidden_sizes, z_dim, z_dim, out_size_w, out_size_b)
    output_hn = init_hypernetwork(k_out, hidden_sizes, z_dim, z_dim, out_size_w, out_size_b)

    in_embeddings = jax.random.normal(k_emb_in, (*in_tiling, embedding_dim), jnp.float32)
    hidden_embeddings = [jax.random.normal(k_emb_hid, (*hidden_tiling[0], embedding_dim),
                                           jnp.float32)]
    out_embeddings = jax.random.normal(k_emb_out, (*out_tiling, embedding_dim), jnp.float32)

    gen = HyperNetworkGeneratorPallas(
        input_hn, hidden_hn, output_hn,
        in_tiling, hidden_tiling, out_tiling,
        in_embeddings, hidden_embeddings, out_embeddings,
        layer_sizes=layer_sizes, scale_layer_out=True, scale_parameter=1.0,
        target_block_rows=2048)

    command = jax.random.normal(k_cmd, (batch_size, command_dim), jnp.float32)
    conditioning = jax.random.normal(k_cond, (batch_size, conditioning_dim), jnp.float32)

    out = gen.forward(command, conditioning)
    out = jax.block_until_ready(out)

    ref = gen.forward_reference(command, conditioning)
    ref = jax.block_until_ready(ref)

    assert out.shape == ref.shape, (out.shape, ref.shape)
    assert jnp.allclose(out, ref, rtol=1e-5, atol=1e-5), "Pallas output != reference"

    print("KERNEL_OK")
</pallas_src>

<mosaic_0001>
module attributes {stable_mosaic.version = 11 : i64} {
  func.func @_hyper_layer_kernel(%arg0: i32, %arg1: memref<8x4xf32, #tpu.memory_space<vmem>>, %arg2: memref<8x64xf32, #tpu.memory_space<vmem>>, %arg3: memref<4x64xf32, #tpu.memory_space<vmem>>, %arg4: memref<64x128xf32, #tpu.memory_space<vmem>>, %arg5: memref<1x128xf32, #tpu.memory_space<vmem>>, %arg6: memref<8x128xf32, #tpu.memory_space<vmem>>) attributes {dimension_semantics = [#tpu.dimension_semantics<parallel>], iteration_bounds = array<i64: 1>, scalar_prefetch = 0 : i64, scratch_operands = 0 : i64, tpu.core_type = #tpu.core_type<tc>, window_params = [{transform_indices = @transform_0, window_bounds = array<i64: 8, 4>}, {pipeline_mode = #tpu.pipeline_mode<synchronous>, transform_indices = @transform_1, window_bounds = array<i64: 8, 64>}, {pipeline_mode = #tpu.pipeline_mode<synchronous>, transform_indices = @transform_2, window_bounds = array<i64: 4, 64>}, {pipeline_mode = #tpu.pipeline_mode<synchronous>, transform_indices = @transform_3, window_bounds = array<i64: 64, 128>}, {pipeline_mode = #tpu.pipeline_mode<synchronous>, transform_indices = @transform_4, window_bounds = array<i64: 1, 128>}, {transform_indices = @transform_5, window_bounds = array<i64: 8, 128>}]} {
    %c0 = arith.constant 0 : index
    %c0_0 = arith.constant 0 : index
    %0 = vector.load %arg1[%c0, %c0_0] : memref<8x4xf32, #tpu.memory_space<vmem>>, vector<8x4xf32>
    %c0_1 = arith.constant 0 : index
    %c0_2 = arith.constant 0 : index
    %1 = vector.load %arg3[%c0_1, %c0_2] : memref<4x64xf32, #tpu.memory_space<vmem>>, vector<4x64xf32>
    %cst = arith.constant dense<0.000000e+00> : vector<8x64xf32>
    %2 = tpu.matmul %0, %1, %cst {dimension_numbers = #tpu.dot_dimension_numbers<[1], [0], [0], [1], [0, 0, 1, 1], [], []>} : vector<8x4xf32>, vector<4x64xf32>, vector<8x64xf32> -> vector<8x64xf32>
    %c0_3 = arith.constant 0 : index
    %c0_4 = arith.constant 0 : index
    %3 = vector.load %arg2[%c0_3, %c0_4] : memref<8x64xf32, #tpu.memory_space<vmem>>, vector<8x64xf32>
    %4 = arith.addf %2, %3 : vector<8x64xf32>
    %cst_5 = arith.constant 0.000000e+00 : f32
    %5 = vector.broadcast %cst_5 : f32 to vector<8x64xf32>
    %6 = arith.maximumf %4, %5 : vector<8x64xf32>
    %c0_6 = arith.constant 0 : index
    %c0_7 = arith.constant 0 : index
    %7 = vector.load %arg4[%c0_6, %c0_7] : memref<64x128xf32, #tpu.memory_space<vmem>>, vector<64x128xf32>
    %c0_8 = arith.constant 0 : index
    %c0_9 = arith.constant 0 : index
    %8 = vector.load %arg5[%c0_8, %c0_9] : memref<1x128xf32, #tpu.memory_space<vmem>>, vector<1x128xf32>
    %cst_10 = arith.constant dense<0.000000e+00> : vector<8x128xf32>
    %9 = tpu.matmul %6, %7, %cst_10 {dimension_numbers = #tpu.dot_dimension_numbers<[1], [0], [0], [1], [0, 0, 1, 1], [], []>} : vector<8x64xf32>, vector<64x128xf32>, vector<8x128xf32> -> vector<8x128xf32>
    %10 = vector.broadcast %8 : vector<1x128xf32> to vector<8x128xf32>
    %11 = arith.addf %9, %10 : vector<8x128xf32>
    %cst_11 = arith.constant 5.000000e-01 : f32
    %12 = vector.broadcast %cst_11 : f32 to vector<8x128xf32>
    %13 = arith.mulf %11, %12 : vector<8x128xf32>
    %c0_12 = arith.constant 0 : index
    %c0_13 = arith.constant 0 : index
    %14 = vector.load %arg6[%c0_12, %c0_13] : memref<8x128xf32, #tpu.memory_space<vmem>>, vector<8x128xf32>
    tpu.vector_store %arg6[%c0_12, %c0_13], %13 {strides = array<i32>} : memref<8x128xf32, #tpu.memory_space<vmem>>, vector<8x128xf32>,
    return
  }
  func.func @transform_0(%arg0: i32) -> (i32, i32) {
    %c0_i32 = arith.constant 0 : i32
    %c0_i32_0 = arith.constant 0 : i32
    return %arg0, %c0_i32 : i32, i32
  }
  func.func @transform_1(%arg0: i32) -> (i32, i32) {
    %c0_i32 = arith.constant 0 : i32
    %c0_i32_0 = arith.constant 0 : i32
    %c0_i32_1 = arith.constant 0 : i32
    return %c0_i32, %c0_i32_0 : i32, i32
  }
  func.func @transform_2(%arg0: i32) -> (i32, i32) {
    %c0_i32 = arith.constant 0 : i32
    %c0_i32_0 = arith.constant 0 : i32
    %c0_i32_1 = arith.constant 0 : i32
    return %c0_i32, %c0_i32_0 : i32, i32
  }
  func.func @transform_3(%arg0: i32) -> (i32, i32) {
    %c0_i32 = arith.constant 0 : i32
    %c0_i32_0 = arith.constant 0 : i32
    %c0_i32_1 = arith.constant 0 : i32
    return %c0_i32, %c0_i32_0 : i32, i32
  }
  func.func @transform_4(%arg0: i32) -> (i32, i32) {
    %c0_i32 = arith.constant 0 : i32
    %c0_i32_0 = arith.constant 0 : i32
    %c0_i32_1 = arith.constant 0 : i32
    return %c0_i32, %c0_i32_0 : i32, i32
  }
  func.func @transform_5(%arg0: i32) -> (i32, i32) {
    %c0_i32 = arith.constant 0 : i32
    %c0_i32_0 = arith.constant 0 : i32
    return %arg0, %c0_i32 : i32, i32
  }
}

</mosaic_0001>

<bundles_post_ra>
// kernel: tpu_custom_call.1
= control target key start
LH: loop header
LB: loop body
LE: loop exit
PB: predicated region body
PF: predicated region fallthrough
CT: control target
= control target key end

     0   :  { %10 = vsyncpa [#allocation3], 0  ;;  %s402_s0 = inlined_call_operand.vmem [shape: f32[8,4], index: 0, kind: input, shape index: {}]   ;;  %s403_s1 = inlined_call_operand.vmem [shape: f32[8,64], index: 1, kind: input, shape index: {}]   ;;  %s404_s2 = inlined_call_operand.vmem [shape: f32[4,64], index: 2, kind: input, shape index: {}]   ;;  %s405_s3 = inlined_call_operand.hbm [shape: f32[64,128], index: 3, kind: input, shape index: {}]   ;;  %s406_s4 = inlined_call_operand.vmem [shape: f32[1,128], index: 4, kind: input, shape index: {}]   ;;  %s407_s5 = inlined_call_operand.hbm [shape: f32[8,128], index: 5, kind: output, shape index: {}]  }
   0x1   :  { %11 = vsyncpa [#allocation4], 0  ;;  %s329_s18 = smov [#allocation2]   ;;  %s281_s22 = scalar_lea.hbm %s405_s3, 1024 }
   0x2   :  { %s23_s19 = sshll.u32 %s329_s18, 4  ;;  %p282_p0 = scmp.ne.s32.totalorder %s405_s3, %s281_s22  ;;  %s24_s19 = int_to_ptr.vmem [resolvable:$true] %s23_s19 }
   0x3   :  { %p285_p1 = scmp.lt.u32.totalorder %s281_s22, %s405_s3 }
   0x5   :  { %p287_p2 = pnand %p285_p1, %p282_p0 }
   0x7   :  { %290 = shalt.err (!%p287_p2)
}
   0x8   :  { %s291_s27 = scalar_lea.vmem %s24_s19, 1024  ;;  %p296_p4 = scmp.lt.s32.totalorder %s24_s19, %s24_s19 }
   0x9   :  { %p292_p3 = scmp.ne.s32.totalorder %s24_s19, %s291_s27  ;;  %p297_p5 = scmp.lt.s32.totalorder %s291_s27, %s291_s27 }
   0xb   :  { %p298_p6 = por %p297_p5, %p296_p4 }
   0xd   :  { %p299_p7 = pnand %p298_p6, %p292_p3 }
   0xf   :  { %302 = shalt.err (!%p299_p7)
}
  0x10   :  { %s330_s28 = smov 128   ;;  %s331_s29 = smov 8  }
  0x11   :  { %29 = dma.hbm_to_vmem [thread:$0]  %s405_s3, 1024, %s24_s19, [#allocation3], %s330_s28, %s330_s28, %s331_s29  }
  0x12   :  { %325 = dma.done.wait [#allocation3], 1024  }
  0x13   :  { %326 = vsyncadd [#allocation3], 4294966272  ;;  %v332_v0 = vmov 0.0   ;;  %vm333_vm0 = vmmov 0   ;;  %v334_v1 = vmov 0.0|0.0   ;;  %vm42_vm1 = vcmask 1043456  }
  0x14   :  { %238 = vmatprep.subr.mxu0 %v332_v0  ;;  %240 = vmatprep.mubr.msk.f32.mxu0 %vm333_vm0, %v332_v0  ;;  %vm38_vm2 = vcmask 31744   ;;  %v36_v2 = vld [vmem:[%s404_s2] sm:$0xf]  ;;  %v117_v4 = vld [vmem:[#allocation2] sm:$0xff]  ;;  %v118_v5 = vld [vmem:[#allocation2 + $0x8] sm:$0xff]  ;;  %vm132_vm3 = vcmask 523264  }
  0x15   :  { %262 = vmatprep.subr.bf16.mxu1 %v334_v1  ;;  %259 = vmatprep.mubr.msk.f32.mxu1 %vm333_vm0, %v332_v0  ;;  %v35_v3 = vld [vmem:[%s402_s0] sm:$0xff]  ;;  %v119_v6 = vld [vmem:[#allocation2 + $0x10] sm:$0xff]  ;;  %v263_v8 = vpack.c.bf16 %v118_v5, %v117_v4  ;;  %v121_v10 = vld [vmem:[#allocation2 + $0x20] sm:$0xff]  ;;  %s335_s12 = smov [#allocation5]  }
  0x16   :  { %239 = vmatpush3.msk.msra.mxu0 %vm42_vm1, %v36_v2  ;;  %v120_v7 = vld [vmem:[#allocation2 + $0x18] sm:$0xff]  ;;  %v122_v11 = vld [vmem:[#allocation2 + $0x28] sm:$0xff]  ;;  %v123_v13 = vld [vmem:[#allocation2 + $0x30] sm:$0xff]  ;;  %s214_s13 = sshll.u32 %s335_s12, 4  ;;  %s215_s13 = int_to_ptr.vmem [resolvable:$true] %s214_s13 }
  0x17   :  { %241 = vmatmul.mubr.msk.f32.vlgmr.msra.gmra.mrb[0].mxu0 %vm38_vm2, %v35_v3  ;;  %264 = vmatpush3.bf16.msra.mxu1 %v263_v8  ;;  %v266_v9 = vpack.c.bf16 %v120_v7, %v119_v6  ;;  %v269_v12 = vpack.c.bf16 %v122_v11, %v121_v10  ;;  %v124_v14 = vld [vmem:[#allocation2 + $0x38] sm:$0xff]  ;;  %s303_s14 = scalar_lea.vmem %s215_s13, 128  ;;  %p308_p9 = scmp.lt.s32.totalorder %s215_s13, %s215_s13 }
  0x18   :  { %265 = vmatprep.subr.bf16.mxu1 %v334_v1  ;;  %v272_v15 = vpack.c.bf16 %v124_v14, %v123_v13  ;;  %v37_v16 = vld [vmem:[%s403_s1] sm:$0xff]  ;;  %p304_p8 = scmp.ne.s32.totalorder %s215_s13, %s303_s14  ;;  %p309_p10 = scmp.lt.s32.totalorder %s303_s14, %s303_s14 }
  0x19   :  { %v225_v21 = vld [vmem:[%s406_s4] ss:$0 sm:$0xff] }
  0x1a   :  { %p310_p11 = por %p309_p10, %p308_p9 }
  0x1b   :  { %267 = vmatpush3.bf16.msra.mxu1 %v266_v9 }
  0x1c   :  { %268 = vmatprep.subr.bf16.mxu1 %v334_v1  ;;  %p311_p12 = pnand %p310_p11, %p304_p8 }
  0x1f   :  { %270 = vmatpush3.bf16.msra.mxu1 %v269_v12 }
  0x20   :  { %271 = vmatprep.subr.bf16.mxu1 %v334_v1 }
  0x23   :  { %273 = vmatpush3.bf16.msra.mxu1 %v272_v15 }
  0xea   :  { %v112_v17 = vpop.f32.mrb[0].mxu0 }
  0xeb   :  { %v113_v18 = vadd.f32 %v112_v17, %v37_v16  ;;  %v242_v19 = vpop.f32.mrb[1].mxu0 }
  0xed   :  { %v116_v20 = vmax.f32 %v113_v18, 0.0 }
  0xef   :  { %260 = vmatmul.mubr.msk.f32.vlgmr.msra.gmra.mrb[0].mxu1 %vm132_vm3, %v116_v20 }
 0x1c2   :  { %v202_v22 = vpop.f32.mrb[0].mxu1 }
 0x1c3   :  { %v203_v23 = vadd.f32 %v225_v21, %v202_v22  ;;  %v261_v24 = vpop.f32.mrb[1].mxu1 }
 0x1c5   :  { %v206_v25 = vmul.f32 0.5, %v203_v23 }
 0x1c7   :  { %207 = vst [vmem:[#allocation5] sm:$0xff] %v206_v25 }
 0x1c8   :  { %314 = shalt.err (!%p311_p12)
}
 0x1c9   :  { %s315_s16 = scalar_lea.hbm %s407_s5, 128 }
 0x1ca   :  { %p316_p13 = scmp.ne.s32.totalorder %s407_s5, %s315_s16  ;;  %p319_p0 = scmp.lt.u32.totalorder %s315_s16, %s407_s5 }
 0x1cc   :  { %p321_p1 = pnand %p319_p0, %p316_p13 }
 0x1ce   :  { %324 = shalt.err (!%p321_p1)
}
 0x1cf   :  { %217 = dma.vmem_to_hbm [thread:$0]  %s215_s13, 128, %s407_s5, [#allocation4]  }
 0x1d0   :  { %327 = dma.done.wait [#allocation4], 128  }
 0x1d1   :  { %328 = vsyncadd [#allocation4], 4294967168 }
 0x1d2   :  { %221 = vsyncpa [#allocation3], 1 }
 0x1d3   :  { %222 = vsyncpa [#allocation4], 1 }

</bundles_post_ra>
